<compile_context>
chip_gen: v7x
topology: tpu7x:2x2x1
jax: 0.10.0
libtpu: 0.0.40
codegen_flags: <defaults>
</compile_context>

<pallas_src>
import jax
import jax.numpy as jnp
from jax import lax
from jax.experimental import pallas as pl
from jax.experimental.pallas import tpu as pltpu

_MIB = 1024 * 1024


# ---------------------------------------------------------------------------
# Kernels
# ---------------------------------------------------------------------------

def _adaln_kernel(c_ref, w_ref, b_ref, mod_ref):
    """mod = SiLU(c) @ W_ada + b_ada for the whole batch (one small matmul).

    c_ref:   (B, H)   f32
    w_ref:   (H, 2H)  bf16 (pre-transposed torch weight)
    b_ref:   (1, 2H)  f32
    mod_ref: (B, 2H)  f32
    """
    c = c_ref[...].astype(jnp.float32)
    c_silu = c * jax.nn.sigmoid(c)                         # SiLU on VPU/EUP
    mod = jnp.dot(c_silu.astype(w_ref.dtype), w_ref[...],
                  preferred_element_type=jnp.float32)      # bf16 MXU, f32 acc
    mod_ref[...] = (mod + b_ref[...].astype(jnp.float32)).astype(mod_ref.dtype)


def _final_layer_kernel(x_ref, mod_ref, w_ref, b_ref, o_ref):
    """LayerNorm (eps=1e-6, no affine) -> modulate -> Linear(H, tile_n cols).

    x_ref:   (1, tile_t, H)        input tile
    mod_ref: (1, 2H)               per-batch (shift | scale) row, f32
    w_ref:   (H, tile_n)           final linear weight slab (bf16)
    b_ref:   (1, tile_n)           final linear bias slab (f32)
    o_ref:   (1, tile_t, tile_n)   output tile
    """
    H = x_ref.shape[-1]
    x = x_ref[0].astype(jnp.float32)                       # (tile_t, H)

    # One-pass LayerNorm statistics in f32: var = E[x^2] - mu^2 (both
    # reductions over the same data, no dependent second pass).
    mu = jnp.mean(x, axis=-1, keepdims=True)
    msq = jnp.mean(x * x, axis=-1, keepdims=True)
    var = jnp.maximum(msq - mu * mu, 0.0)
    xn = (x - mu) * lax.rsqrt(var + 1e-6)

    # modulate: split the per-batch modulation row into shift / scale.
    m = mod_ref[...].astype(jnp.float32)                   # (1, 2H)
    shift = m[:, :H]
    scale = m[:, H:]
    y = xn * (1.0 + scale) + shift                         # (tile_t, H)

    # Final linear slab on the MXU: bf16 inputs, f32 accumulation.
    out = jnp.dot(y.astype(w_ref.dtype), w_ref[...],
                  preferred_element_type=jnp.float32)
    out = out + b_ref[...].astype(jnp.float32)             # (tile_t, tile_n)
    o_ref[0] = out.astype(o_ref.dtype)


# ---------------------------------------------------------------------------
# VMEM budgeting / tile planning (generation-aware)
# ---------------------------------------------------------------------------

def _vmem_capacity_bytes():
    """Physical VMEM per TensorCore; conservative (64 MiB) when unknown."""
    try:
        cap = getattr(pltpu.get_tpu_info(), "vmem_capacity_bytes", None)
        if cap:
            return int(cap)
    except Exception:
        pass
    try:
        kind = jax.devices()[0].device_kind.lower()
    except Exception:
        kind = ""
    if "v7" in kind:
        return 64 * _MIB
    if any(t in kind for t in ("v5e", "v5 lite", "v5lite", "v5p", "v6", "trillium")):
        return 128 * _MIB
    return 64 * _MIB  # unknown chip: be conservative


def _plan_tiles(T, H, x_bytes, out_bytes, budget):
    """Solve (tile_t, tile_n) so the per-step working set fits `budget`.

    Model: double-buffered x/out/mod blocks + (worst-case double-buffered)
    bf16 weight slab + in-kernel f32 temporaries (x, xn, y, out, bf16 y copy).
    """
    two_h = 2 * H

    def max_tile_t(tile_n):
        fixed = 2 * H * tile_n * 2 + 2 * tile_n * 4 + 2 * two_h * 4
        per_t = (2 * H * x_bytes            # x blocks (double-buffered)
                 + 2 * tile_n * out_bytes   # out blocks (double-buffered)
                 + 4 * H * 4                # f32 temps: x, xn, y, ...
                 + H * 2                    # bf16 copy of y
                 + tile_n * 4)              # f32 out before cast
        avail = budget - fixed
        return max(avail // per_t, 0) if avail > 0 else 0

    # Candidate output-column tiles: 2H, then halves that stay multiples of 128.
    candidates = [two_h]
    n = two_h
    while n % 2 == 0 and n // 2 >= 128 and (n // 2) % 128 == 0:
        n //= 2
        candidates.append(n)

    tile_n = candidates[-1]
    for cand in candidates:  # prefer the widest (most lane-dense) slab that fits
        if (2 * H * cand * 2) <= budget // 3 and max_tile_t(cand) >= min(256, T):
            tile_n = cand
            break

    # tile_t: as large as the budget allows, capped at 512 (~85% of roofline),
    # multiple of 8 dividing T; fall back to a single full-T block.
    cap_t = min(max_tile_t(tile_n), 512, T)
    tile_t = T
    if T > cap_t:
        t = max((cap_t // 8) * 8, 8)
        while t >= 8 and T % t != 0:
            t -= 8
        tile_t = t if (t >= 8 and T % t == 0) else T
    return tile_t, tile_n


def _main_vmem_limit(tile_t, tile_n, H, x_bytes, out_bytes, cap):
    two_h = 2 * H
    need = (2 * H * tile_n * 2                       # w_lin bf16 (worst case 2 bufs)
            + 2 * tile_n * 4                         # bias blocks
            + 2 * two_h * 4                          # mod row blocks
            + 2 * tile_t * H * x_bytes               # x blocks
            + 2 * tile_t * tile_n * out_bytes        # out blocks
            + tile_t * (4 * H * 4 + H * 2 + tile_n * 4)   # in-kernel temps
            + 4 * _MIB)                              # compiler scratch headroom
    return int(min(max(need, 16 * _MIB), cap - 4 * _MIB))


def _adaln_vmem_limit(B, H, cap):
    need = (H * 2 * H * 2            # w_ada bf16
            + 2 * B * H * 4          # c + SiLU temp
            + 3 * B * 2 * H * 4      # mod f32 + temps
            + 2 * H * 4              # bias
            + 4 * _MIB)
    return int(min(max(need, 16 * _MIB), cap - 4 * _MIB))


# ---------------------------------------------------------------------------
# Wrapper
# ---------------------------------------------------------------------------

def final_layer(x, c, params, *, tile_t=None, tile_n=None, out_dtype=None):
    """x: (B, T, H), c: (B, H) -> (B, T, 2H)."""
    B, T, H = x.shape
    two_h = 2 * H
    w_ada, b_ada, w_lin, b_lin = params   # (H,2H) bf16, (1,2H) f32, (H,2H) bf16, (1,2H) f32
    out_dtype = x.dtype if out_dtype is None else jnp.dtype(out_dtype)
    x_bytes = x.dtype.itemsize
    out_bytes = jnp.dtype(out_dtype).itemsize

    cap = _vmem_capacity_bytes()
    budget = (cap * 3) // 4               # ~48 MiB on v7x, ~96 MiB on v5e/v6e

    # --- adaLN modulation: one tiny Pallas call over the whole batch ---------
    mod = pl.pallas_call(
        _adaln_kernel,
        out_shape=jax.ShapeDtypeStruct((B, two_h), jnp.float32),
        compiler_params=pltpu.CompilerParams(
            vmem_limit_bytes=_adaln_vmem_limit(B, H, cap)),
    )(c, w_ada, b_ada)

    # --- main tiled kernel ----------------------------------------------------
    auto_t, auto_n = _plan_tiles(T, H, x_bytes, out_bytes, budget)
    tile_t = auto_t if tile_t is None else tile_t
    tile_n = auto_n if tile_n is None else tile_n
    num_t, num_n = T // tile_t, two_h // tile_n

    cost = pl.CostEstimate(
        flops=2 * B * T * H * two_h + 10 * B * T * H,
        transcendentals=B * T,
        bytes_accessed=(num_n * B * T * H * x_bytes       # x (re-read per n slab)
                        + B * T * two_h * out_bytes       # out
                        + B * num_n * H * tile_n * 2      # bf16 weight slabs
                        + B * two_h * 4                   # mod rows
                        + two_h * 4),                     # bias
    )
    vmem_limit = _main_vmem_limit(tile_t, tile_n, H, x_bytes, out_bytes, cap)

    def build(single_buffer_weights):
        w_mode = {}
        if single_buffer_weights:
            # Constant-index blocks: one buffer, DMA'd once, zero re-fetch cost.
            w_mode = dict(pipeline_mode=pl.Buffered(1))
        grid_spec = pltpu.PrefetchScalarGridSpec(
            num_scalar_prefetch=0,
            # t is fastest so the weight slab only changes when n (or b) does.
            grid=(B, num_n, num_t),
            in_specs=[
                pl.BlockSpec((1, tile_t, H), lambda b, n, t: (b, t, 0)),        # x
                pl.BlockSpec((1, two_h), lambda b, n, t: (b, 0)),               # mod
                pl.BlockSpec((H, tile_n), lambda b, n, t: (0, n), **w_mode),    # w_lin
                pl.BlockSpec((1, tile_n), lambda b, n, t: (0, n), **w_mode),    # b_lin
            ],
            out_specs=pl.BlockSpec((1, tile_t, tile_n), lambda b, n, t: (b, t, n)),
        )
        return pl.pallas_call(
            _final_layer_kernel,
            out_shape=jax.ShapeDtypeStruct((B, T, two_h), out_dtype),
            grid_spec=grid_spec,
            compiler_params=pltpu.CompilerParams(
                dimension_semantics=("parallel", "parallel", "parallel"),
                vmem_limit_bytes=vmem_limit),
            cost_estimate=cost,
        )

    if num_n == 1:
        # Weight block never changes -> single-buffer it. Fall back to default
        # double buffering if this jax/libtpu combo rejects Buffered(1).
        try:
            return build(True)(x, mod, w_lin, b_lin)
        except Exception:
            pass
    return build(False)(x, mod, w_lin, b_lin)


# ---------------------------------------------------------------------------
# Params / reference
# ---------------------------------------------------------------------------

def init_params(key, hidden_size):
    """Synthetic parameters matching the PyTorch module shapes."""
    H = hidden_size
    k1, k2, k3, k4 = jax.random.split(key, 4)
    # adaLN_modulation Linear(H, 2H): torch weight (2H, H), bias (2H,)
    w_ada = jax.random.normal(k1, (2 * H, H), jnp.float32) * 0.02
    b_ada = jax.random.normal(k2, (2 * H,), jnp.float32) * 0.02
    # final linear Linear(H, 2H): torch weight (2H, H), bias (2H,)
    w_lin = jax.random.normal(k3, (2 * H, H), jnp.float32) * 0.02
    b_lin = jax.random.normal(k4, (2 * H,), jnp.float32) * 0.02

    # Kernel params: pre-transposed to (in, out); weights stored in bf16 ONCE
    # here (no per-call cast / extra HBM round trip); biases as (1, 2H) f32.
    params = (jnp.transpose(w_ada).astype(jnp.bfloat16), b_ada.reshape(1, 2 * H),
              jnp.transpose(w_lin).astype(jnp.bfloat16), b_lin.reshape(1, 2 * H))
    raw = (w_ada, b_ada, w_lin, b_lin)
    return params, raw


def reference(x, c, raw_params):
    """Pure-JAX (f32) reference mirroring the PyTorch forward."""
    w_ada, b_ada, w_lin, b_lin = raw_params
    H = x.shape[-1]
    mod = jax.nn.silu(c) @ w_ada.T + b_ada                    # (B, 2H)
    shift, scale = mod[:, :H], mod[:, H:]
    mu = jnp.mean(x, axis=-1, keepdims=True)
    var = jnp.mean((x - mu) ** 2, axis=-1, keepdims=True)
    xn = (x - mu) * jax.lax.rsqrt(var + 1e-6)
    y = xn * (1.0 + scale[:, None, :]) + shift[:, None, :]
    return y @ w_lin.T + b_lin


if __name__ == "__main__":
    B, T, H = 2, 8, 32          # batch, seq, hidden_size (small test shapes)
    key = jax.random.PRNGKey(0)
    kx, kc, kp = jax.random.split(key, 3)

    x = jax.random.normal(kx, (B, T, H), jnp.float32)
    c = jax.random.normal(kc, (B, H), jnp.float32)
    params, raw_params = init_params(kp, H)

    out = jax.block_until_ready(final_layer(x, c, params))
    ref = reference(x, c, raw_params)

    assert out.shape == (B, T, 2 * H)
    # Tolerance accounts for bf16 matmuls (f32 accumulation).
    max_err = float(jnp.max(jnp.abs(out - ref)))
    assert jnp.allclose(out, ref, atol=1e-2, rtol=1e-2), (
        f"mismatch vs reference (max abs err {max_err})")

    print("KERNEL_OK")
</pallas_src>

<mosaic_0001>
module attributes {stable_mosaic.version = 11 : i64} {
  func.func @_adaln_kernel(%arg0: memref<2x32xf32, #tpu.memory_space<vmem>>, %arg1: memref<32x64xbf16, #tpu.memory_space<vmem>>, %arg2: memref<1x64xf32, #tpu.memory_space<vmem>>, %arg3: memref<2x64xf32, #tpu.memory_space<vmem>>) attributes {dimension_semantics = [], scalar_prefetch = 0 : i64, scratch_operands = 0 : i64, tpu.core_type = #tpu.core_type<tc>} {
    %c0 = arith.constant 0 : index
    %c0_0 = arith.constant 0 : index
    %0 = vector.load %arg0[%c0, %c0_0] : memref<2x32xf32, #tpu.memory_space<vmem>>, vector<2x32xf32>
    %1 = arith.negf %0 : vector<2x32xf32>
    %2 = math.exp %1 : vector<2x32xf32>
    %cst = arith.constant 1.000000e+00 : f32
    %3 = vector.broadcast %cst : f32 to vector<2x32xf32>
    %4 = arith.addf %3, %2 : vector<2x32xf32>
    %5 = arith.divf %3, %4 : vector<2x32xf32>
    %6 = arith.mulf %0, %5 : vector<2x32xf32>
    %7 = arith.truncf %6 : vector<2x32xf32> to vector<2x32xbf16>
    %c0_1 = arith.constant 0 : index
    %c0_2 = arith.constant 0 : index
    %8 = vector.load %arg1[%c0_1, %c0_2] : memref<32x64xbf16, #tpu.memory_space<vmem>>, vector<32x64xbf16>
    %cst_3 = arith.constant dense<0.000000e+00> : vector<2x64xf32>
    %9 = tpu.matmul %7, %8, %cst_3 {dimension_numbers = #tpu.dot_dimension_numbers<[1], [0], [0], [1], [0, 0, 1, 1], [], []>} : vector<2x32xbf16>, vector<32x64xbf16>, vector<2x64xf32> -> vector<2x64xf32>
    %c0_4 = arith.constant 0 : index
    %c0_5 = arith.constant 0 : index
    %10 = vector.load %arg2[%c0_4, %c0_5] : memref<1x64xf32, #tpu.memory_space<vmem>>, vector<1x64xf32>
    %11 = vector.broadcast %10 : vector<1x64xf32> to vector<2x64xf32>
    %12 = arith.addf %9, %11 : vector<2x64xf32>
    %c0_6 = arith.constant 0 : index
    %c0_7 = arith.constant 0 : index
    %13 = vector.load %arg3[%c0_6, %c0_7] : memref<2x64xf32, #tpu.memory_space<vmem>>, vector<2x64xf32>
    tpu.vector_store %arg3[%c0_6, %c0_7], %12 {strides = array<i32>} : memref<2x64xf32, #tpu.memory_space<vmem>>, vector<2x64xf32>,
    return
  }
}

</mosaic_0001>

<bundles_post_ra>
// kernel: tpu_custom_call.1
= control target key start
LH: loop header
LB: loop body
LE: loop exit
PB: predicated region body
PF: predicated region fallthrough
CT: control target
= control target key end

     0   :  { %8 = vsyncpa [#allocation3], 0  ;;  %s310_s0 = inlined_call_operand.hbm [shape: f32[2,32], index: 0, kind: input, shape index: {}]   ;;  %s311_s1 = inlined_call_operand.hbm [shape: bf16[32,64], index: 1, kind: input, shape index: {}]   ;;  %s312_s2 = inlined_call_operand.vmem [shape: f32[1,64], index: 2, kind: input, shape index: {}]   ;;  %s313_s3 = inlined_call_operand.hbm [shape: f32[2,64], index: 3, kind: output, shape index: {}]  }
   0x1   :  { %9 = vsyncpa [#allocation6], 0 }
   0x2   :  { %10 = vsyncpa [#allocation4], 0  ;;  %s237_s12 = smov [#allocation2]   ;;  %s238_s14 = smov [#allocation5]  }
   0x3   :  { %s17_s13 = sshll.u32 %s237_s12, 4  ;;  %s26_s15 = sshll.u32 %s238_s14, 4  ;;  %s18_s13 = int_to_ptr.vmem [resolvable:$true] %s17_s13  ;;  %s264_s15 = int_to_ptr.vmem [resolvable:$true] %s26_s15 }
   0x4   :  { %s165_s18 = scalar_lea.hbm %s310_s0, 32 }
   0x5   :  { %p166_p0 = scmp.ne.s32.totalorder %s310_s0, %s165_s18  ;;  %p169_p1 = scmp.lt.u32.totalorder %s165_s18, %s310_s0 }
   0x7   :  { %p171_p2 = pnand %p169_p1, %p166_p0 }
   0x9   :  { %174 = shalt.err (!%p171_p2)
}
   0xa   :  { %s175_s23 = scalar_lea.vmem %s18_s13, 32  ;;  %p180_p4 = scmp.lt.s32.totalorder %s18_s13, %s18_s13 }
   0xb   :  { %p176_p3 = scmp.ne.s32.totalorder %s18_s13, %s175_s23  ;;  %p181_p5 = scmp.lt.s32.totalorder %s175_s23, %s175_s23 }
   0xd   :  { %p182_p6 = por %p181_p5, %p180_p4 }
   0xf   :  { %p183_p7 = pnand %p182_p6, %p176_p3 }
  0x11   :  { %186 = shalt.err (!%p183_p7)
}
  0x12   :  { %20 = dma.hbm_to_vmem [thread:$0]  %s310_s0, 32, %s18_s13, [#allocation3]  }
  0x13   :  { %s187_s28 = scalar_lea.hbm %s311_s1, 256 }
  0x14   :  { %p188_p8 = scmp.ne.s32.totalorder %s311_s1, %s187_s28  ;;  %p191_p9 = scmp.lt.u32.totalorder %s187_s28, %s311_s1 }
  0x16   :  { %p193_p10 = pnand %p191_p9, %p188_p8 }
  0x18   :  { %196 = shalt.err (!%p193_p10)
}
  0x19   :  { %s197_s6 = scalar_lea.vmem %s264_s15, 256  ;;  %p202_p12 = scmp.lt.s32.totalorder %s264_s15, %s264_s15 }
  0x1a   :  { %p198_p11 = scmp.ne.s32.totalorder %s264_s15, %s197_s6  ;;  %p203_p13 = scmp.lt.s32.totalorder %s197_s6, %s197_s6 }
  0x1c   :  { %p204_p0 = por %p203_p13, %p202_p12 }
  0x1e   :  { %p205_p1 = pnand %p204_p0, %p198_p11 }
  0x20   :  { %208 = shalt.err (!%p205_p1)
}
  0x21   :  { %s239_s0 = smov 64   ;;  %s240_s7 = smov 4  }
  0x22   :  { %32 = dma.hbm_to_vmem [thread:$0]  %s311_s1, 256, %s264_s15, [#allocation6], %s239_s0, %s239_s0, %s240_s7  }
  0x23   :  { %231 = dma.done.wait [#allocation3], 32  }
  0x24   :  { %232 = vsyncadd [#allocation3], 4294967264 }
  0x25   :  { %233 = dma.done.wait [#allocation6], 256  }
  0x26   :  { %234 = vsyncadd [#allocation6], 4294967040  ;;  %v241_v0 = vmov 0.0   ;;  %vm242_vm0 = vmmov 0   ;;  %v159_v1 = vld [vmem:[#allocation5] sm:$0xff]   ;;  %v160_v2 = vld [vmem:[#allocation5 + $0x8] sm:$0xff]  }
  0x27   :  { %144 = vmatprep.subr.bf16.mxu0 %v241_v0  ;;  %148 = vmatprep.mubr.msk.bf16.mxu0 %vm242_vm0, %v241_v0  ;;  %v42_v3 = vld [vmem:[#allocation2] sm:$0x3]  ;;  %vm74_vm1 = vcmask 261120   ;;  %s243_s11 = smov [#allocation7]   ;;  %vm118_vm2 = vcmask 517120  }
  0x28   :  { %145 = vmatpush3.bf16.msra.mxu0 %v159_v1  ;;  %v136_v4 = vmul.f32 -1.442695, %v42_v3  ;;  %v137_v10 = vld [vmem:[%s312_s2] ss:$0 sm:$0xff]  ;;  %s126_s12 = sshll.u32 %s243_s11, 4  ;;  %s127_s12 = int_to_ptr.vmem [resolvable:$true] %s126_s12 }
  0x29   :  { %146 = vmatprep.subr.bf16.mxu0 %v241_v0  ;;  %s209_s13 = scalar_lea.vmem %s127_s12, 32  ;;  %p214_p3 = scmp.lt.s32.totalorder %s127_s12, %s127_s12 }
  0x2a   :  { %161 = vpow2.f32 %v136_v4  ;;  %p210_p2 = scmp.ne.s32.totalorder %s127_s12, %s209_s13  ;;  %p215_p4 = scmp.lt.s32.totalorder %s209_s13, %s209_s13 }
  0x2c   :  { %147 = vmatpush3.bf16.msra.mxu0 %v160_v2  ;;  %p216_p5 = por %p215_p4, %p214_p3 }
  0x2e   :  { %p217_p6 = pnand %p216_p5, %p210_p2 }
  0x34   :  { %v162_v5 = vpop.eup %161 }
  0x35   :  { %v46_v6 = vadd.f32 1.0, %v162_v5 }
  0x37   :  { %163 = vrcp.f32 %v46_v6 }
  0x41   :  { %v164_v7 = vpop.eup %163 }
  0x42   :  { %v49_v8 = vmul.f32 %v164_v7, %v42_v3 }
  0x44   :  { %v50_v9 = vpack.c.bf16 %v49_v8, %v49_v8 }
  0x46   :  { %149 = vmatmul.mubr.msk.bf16.vlgmr.msra.gmra.mrb[0].mxu0 %vm74_vm1, %v50_v9 }
 0x119   :  { %v112_v11 = vpop.f32.mrb[0].mxu0 }
 0x11a   :  { %v113_v12 = vadd.f32 %v137_v10, %v112_v11  ;;  %v150_v13 = vpop.f32.mrb[1].mxu0 }
 0x11b   :  { %v115_v14 = vpop.f32.mrb[2].mxu0 }
 0x11c   :  { %v151_v15 = vpop.f32.mrb[3].mxu0  ;;  %119 = vst.msk [vmem:[#allocation7] sm:$0x3] %vm118_vm2, %v113_v12 }
 0x11d   :  { %220 = shalt.err (!%p217_p6)
}
 0x11e   :  { %s221_s2 = scalar_lea.hbm %s313_s3, 32 }
 0x11f   :  { %p222_p7 = scmp.ne.s32.totalorder %s313_s3, %s221_s2  ;;  %p225_p8 = scmp.lt.u32.totalorder %s221_s2, %s313_s3 }
 0x121   :  { %p227_p9 = pnand %p225_p8, %p222_p7 }
 0x123   :  { %230 = shalt.err (!%p227_p9)
}
 0x124   :  { %129 = dma.vmem_to_hbm [thread:$0]  %s127_s12, 32, %s313_s3, [#allocation4]  }
 0x125   :  { %235 = dma.done.wait [#allocation4], 32  }
 0x126   :  { %236 = vsyncadd [#allocation4], 4294967264 }
 0x127   :  { %133 = vsyncpa [#allocation3], 1 }
 0x128   :  { %134 = vsyncpa [#allocation6], 1 }
 0x129   :  { %135 = vsyncpa [#allocation4], 1 }

</bundles_post_ra>
